<compile_context>
chip_gen: v7x
topology: tpu7x:2x2x1
jax: 0.10.0
libtpu: 0.0.40
codegen_flags: <defaults>
</compile_context>

<pallas_src>
import functools
import math

import jax
import jax.numpy as jnp
from jax.experimental import pallas as pl
from jax.experimental.pallas import tpu as pltpu

_LANE = 128
_SUBLANE = 8


def _round_up(x, m):
    return ((x + m - 1) // m) * m


def _vmem_capacity_bytes():
    """Physical VMEM of the current TPU generation (fallback: 64 MiB = v7x)."""
    try:
        info = pltpu.get_tpu_info()
        cap = getattr(info, "vmem_capacity_bytes", None)
        if cap:
            return int(cap)
    except Exception:
        pass
    return 64 * 1024 * 1024


# --------------------------------------------------------------------------
# Kernel
# --------------------------------------------------------------------------
def freq_decomp_moe_kernel(x_ref, fwd_ref, inv_ref, w_ref, b_ref, mask2_ref,
                           o_ref, *, n_chan, freq_len):
    Bt, CP, LP = x_ref.shape
    FP2 = fwd_ref.shape[1]

    xb = x_ref[...]                                          # (Bt, CP, LP) f32

    # --- channel statistics from sum / sum-of-squares over the TRUE channel
    # count (zero-padded channels contribute exactly 0 to both sums).
    inv_c = 1.0 / n_chan
    s1 = jnp.sum(xb, axis=1, keepdims=True)                  # (Bt, 1, LP)
    s2 = jnp.sum(xb * xb, axis=1, keepdims=True)
    mean = s1 * inv_c
    var = (s2 - s1 * mean) * (1.0 / (n_chan - 1)) + 1e-5     # unbiased + eps
    rstd = jax.lax.rsqrt(var)                                # EUP rsqrt
    xn = (xb - mean) * rstd                                  # (Bt, CP, LP)
    if CP != n_chan:
        # zero the padded channels so they contribute nothing downstream
        cmask = (jax.lax.broadcasted_iota(jnp.int32, (1, CP, LP), 1)
                 < n_chan).astype(xn.dtype)
        xn = xn * cmask

    # --- fused rfft: Y = xn @ [cos(0..F) | -sin(0..F) | 0-pad] (one matmul).
    # CP % 8 == 0 and LP % 128 == 0 -> this reshape is a tile-aligned view.
    xn2 = xn.reshape(Bt * CP, LP).astype(fwd_ref.dtype)
    y = jnp.dot(xn2, fwd_ref[...],
                preferred_element_type=jnp.float32)          # (Bt*CP, FP2)

    # --- gating input: channel-mean of |Y|.  In the packed layout
    # |Y[f]|^2 = y[f]^2 + y[f+F]^2; the fold-by-F is a cheap XLU roll.
    y2 = y * y
    mag = jnp.sqrt(y2 + pltpu.roll(y2, shift=FP2 - freq_len, axis=1))
    g_in = jnp.sum(mag.reshape(Bt, CP, FP2), axis=1) * inv_c  # (Bt, FP2)
    # (columns >= freq_len of g_in are junk but hit zero gating weights below)

    # --- softmax(g_in @ W^T + b); W stored lane-dense as (E, FP2), zero
    # beyond column freq_len, contracted on the frequency axis.
    logits = jax.lax.dot_general(
        g_in, w_ref[...], (((1,), (1,)), ((), ())),
        preferred_element_type=jnp.float32) + b_ref[...]      # (Bt, E)
    logits = logits - jnp.max(logits, axis=-1, keepdims=True)
    ex = jnp.exp(logits)
    gate = ex / jnp.sum(ex, axis=-1, keepdims=True)           # exact softmax

    # --- per-frequency weight, pre-duplicated for the Re and Im columns ---
    w2 = jnp.dot(gate, mask2_ref[...],
                 preferred_element_type=jnp.float32)          # (Bt, FP2)

    # --- fused irfft: out = (Y * w2) @ [icos(0..F) ; isin(0..F) ; 0-pad] ---
    y3 = y.reshape(Bt, CP, FP2)
    yw = (y3 * w2[:, None, :]).reshape(Bt * CP, FP2).astype(inv_ref.dtype)
    out_n = jnp.dot(yw, inv_ref[...],
                    preferred_element_type=jnp.float32)       # (Bt*CP, LP)

    # --- de-normalize ---
    std = var * rstd                                          # = sqrt(var)
    o_ref[...] = out_n.reshape(Bt, CP, LP) * std + mean


# --------------------------------------------------------------------------
# Constant (glue) matrices
# --------------------------------------------------------------------------
def make_dft_matrices(L):
    F = L // 2 + 1
    l = jnp.arange(L, dtype=jnp.float32)[:, None]
    f = jnp.arange(F, dtype=jnp.float32)[None, :]
    ang_lf = 2.0 * math.pi * l * f / L                        # (L, F)
    cos_lf = jnp.cos(ang_lf)
    sin_lf = jnp.sin(ang_lf)

    fi = jnp.arange(F)
    special = (fi == 0) | ((L % 2 == 0) & (fi == F - 1))      # DC / Nyquist
    w = jnp.where(special, 1.0, 2.0).astype(jnp.float32)      # Hermitian doubling
    ang_fl = ang_lf.T                                         # (F, L)
    icos_fl = (w[:, None] / L) * jnp.cos(ang_fl)
    isin_fl = -(w[:, None] / L) * jnp.sin(ang_fl)
    isin_fl = jnp.where(special[:, None], 0.0, isin_fl)       # irfft drops imag DC/Nyq
    return cos_lf, sin_lf, icos_fl, isin_fl


def _packed_dft_bases(L, LP, F, FP2, dtype):
    cos_lf, sin_lf, icos_fl, isin_fl = make_dft_matrices(L)
    fwd = jnp.zeros((LP, FP2), jnp.float32)
    fwd = fwd.at[:L, :F].set(cos_lf).at[:L, F:2 * F].set(-sin_lf)
    inv = jnp.zeros((FP2, LP), jnp.float32)
    inv = inv.at[:F, :L].set(icos_fl).at[F:2 * F, :L].set(isin_fl)
    return fwd.astype(dtype), inv.astype(dtype)


def make_band_mask(band_boundaries, freq_len):
    # sigmoid -> sort -> [0, ..., 1] -> integer indices -> per-expert band mask (E, F)
    b = jnp.sort(jax.nn.sigmoid(band_boundaries))
    bounds = jnp.concatenate([jnp.zeros((1,), jnp.float32), b,
                              jnp.ones((1,), jnp.float32)])
    idx = (bounds * freq_len).astype(jnp.int32)
    idx = idx.at[-1].set(freq_len)
    fidx = jnp.arange(freq_len)
    mask = ((fidx[None, :] >= idx[:-1, None]) &
            (fidx[None, :] < idx[1:, None])).astype(jnp.float32)
    return mask                                               # (E, F)


def _pick_batch_tile(B, CP, LP, FP2, basis_bpe, vmem_limit):
    """Generation-aware batch tile: fill VMEM, full MXU-M tiles, >=4 steps."""
    basis_bytes = 2 * LP * FP2 * basis_bpe                    # fwd + inv, single-buffered
    budget = int(0.55 * max(vmem_limit - basis_bytes, 4 * 1024 * 1024))
    # double-buffered x/out tiles (f32) + live f32/basis-dtype intermediates
    per_row = 4 * (6 * LP + 3 * FP2) + basis_bpe * (LP + FP2)
    bt_mem = max(1, budget // (CP * per_row))
    # Bt granularity making Bt*CP a multiple of 256 (v6e/v7x MXU M; also /128 for v5e)
    m_align = max(1, 256 // math.gcd(CP, 256))
    # keep >=~4 grid steps when B allows (pipeline overlap + both v7x TCs),
    # but never shrink below one full MXU-M tile of rows.
    steps_cap = max(1, B // 4) if B >= 4 else max(1, B)
    bt = min(bt_mem, B, max(steps_cap, m_align))
    if bt >= m_align:
        bt = (bt // m_align) * m_align
    return max(1, int(bt))


# --------------------------------------------------------------------------
# Wrapper
# --------------------------------------------------------------------------
@functools.partial(jax.jit, static_argnames=("matmul_dtype", "batch_tile"))
def freq_decomp_moe(x, band_boundaries, gating_w, gating_b, *,
                    matmul_dtype=jnp.bfloat16, batch_tile=None):
    """x: (B, C, L) float32. Returns (B, C, L) float32."""
    B, C, L = x.shape
    if C < 2:
        raise ValueError("FreqDecompMoE requires C >= 2 (unbiased channel variance).")
    F = L // 2 + 1
    E = gating_w.shape[0]

    CP = _round_up(C, _SUBLANE)                               # sublane-aligned channels
    LP = L if L % _LANE == 0 else _round_up(L, _LANE)         # lane-dense seq dim
    FP2 = _round_up(2 * F, _LANE)                             # packed [Re|Im] spectrum

    vmem_cap = _vmem_capacity_bytes()
    vmem_limit = max(min(vmem_cap - (16 << 20), 112 << 20), 32 << 20)
    basis_bpe = jnp.dtype(matmul_dtype).itemsize

    fwd, inv = _packed_dft_bases(L, LP, F, FP2, matmul_dtype)
    bmask = make_band_mask(band_boundaries, F)                # (E, F)
    mask2 = jnp.zeros((E, FP2), jnp.float32)
    mask2 = mask2.at[:, :F].set(bmask).at[:, F:2 * F].set(bmask)
    w_pad = jnp.zeros((E, FP2), jnp.float32).at[:, :F].set(
        gating_w.astype(jnp.float32))
    b2 = gating_b.reshape(1, E).astype(jnp.float32)

    if batch_tile is not None:
        Bt = max(1, min(int(batch_tile), B))
    else:
        Bt = max(1, min(_pick_batch_tile(B, CP, LP, FP2, basis_bpe, vmem_limit), B))
    Bpad = _round_up(B, Bt)

    xp = x.astype(jnp.float32)
    needs_pad = (Bpad, CP, LP) != (B, C, L)
    if needs_pad:
        xp = jnp.pad(xp, ((0, Bpad - B), (0, CP - C), (0, LP - L)))

    const = lambda i: (0, 0)
    single = pl.Buffered(1)   # constants never change -> no double buffering
    grid_spec = pltpu.PrefetchScalarGridSpec(
        num_scalar_prefetch=0,
        grid=(Bpad // Bt,),
        in_specs=[
            pl.BlockSpec((Bt, CP, LP), lambda i: (i, 0, 0)),
            pl.BlockSpec((LP, FP2), const, pipeline_mode=single),
            pl.BlockSpec((FP2, LP), const, pipeline_mode=single),
            pl.BlockSpec((E, FP2), const, pipeline_mode=single),
            pl.BlockSpec((1, E), const, pipeline_mode=single),
            pl.BlockSpec((E, FP2), const, pipeline_mode=single),
        ],
        out_specs=pl.BlockSpec((Bt, CP, LP), lambda i: (i, 0, 0)),
    )

    kernel = functools.partial(freq_decomp_moe_kernel, n_chan=C, freq_len=F)
    out = pl.pallas_call(
        kernel,
        out_shape=jax.ShapeDtypeStruct((Bpad, CP, LP), jnp.float32),
        grid_spec=grid_spec,
        compiler_params=pltpu.CompilerParams(
            dimension_semantics=("parallel",),   # independent batch tiles
            vmem_limit_bytes=int(vmem_limit),
        ),
    )(xp, fwd, inv, w_pad, b2, mask2)

    if needs_pad:
        out = out[:B, :C, :L]
    return out


# --------------------------------------------------------------------------
# Pure-JAX reference (mirrors the PyTorch forward, uses jnp.fft)
# --------------------------------------------------------------------------
def reference_forward(x, band_boundaries, gating_w, gating_b):
    B, C, L = x.shape
    xp = jnp.transpose(x, (0, 2, 1))                          # (B, L, C)
    mean = jnp.mean(xp, axis=2, keepdims=True)
    xc = xp - mean
    var = jnp.var(xc, axis=2, keepdims=True, ddof=1) + 1e-5
    xn = jnp.transpose(xc / jnp.sqrt(var), (0, 2, 1))         # (B, C, L)

    fx = jnp.fft.rfft(xn, axis=-1)
    F = fx.shape[-1]
    mask = make_band_mask(band_boundaries, F)                 # (E, F)
    mag = jnp.abs(fx)
    g_in = jnp.mean(mag, axis=1)                              # (B, F)
    g = jax.nn.softmax(g_in @ gating_w.T + gating_b, axis=-1) # (B, E)
    wf = g @ mask                                             # (B, F)
    comb = fx * wf[:, None, :]
    out = jnp.fft.irfft(comb, n=L, axis=-1)                   # (B, C, L)
    # (PyTorch also computes `residual = x - combined_output` but never uses it)
    outp = jnp.transpose(out, (0, 2, 1)) * jnp.sqrt(var) + mean
    return jnp.transpose(outp, (0, 2, 1)).astype(jnp.float32)


if __name__ == "__main__":
    B, C, L, E = 6, 4, 16, 4
    F = L // 2 + 1

    key = jax.random.PRNGKey(0)
    k1, k2, k3, k4 = jax.random.split(key, 4)

    # deterministic parameter init (mirrors torch.rand / nn.Linear default init)
    band_boundaries = jax.random.uniform(k1, (E - 1,), dtype=jnp.float32)
    bound = 1.0 / math.sqrt(F)
    gating_w = jax.random.uniform(k2, (E, F), minval=-bound, maxval=bound,
                                  dtype=jnp.float32)
    gating_b = jax.random.uniform(k3, (E,), minval=-bound, maxval=bound,
                                  dtype=jnp.float32)
    x = jax.random.normal(k4, (B, C, L), dtype=jnp.float32)

    ref = jax.block_until_ready(
        reference_forward(x, band_boundaries, gating_w, gating_b))
    ref_scale = float(jnp.max(jnp.abs(ref)))

    # f32 basis path (tight check), auto batch tile.
    out_f32 = jax.block_until_ready(
        freq_decomp_moe(x, band_boundaries, gating_w, gating_b,
                        matmul_dtype=jnp.float32))
    err_f32 = float(jnp.max(jnp.abs(out_f32 - ref)))
    if err_f32 > 5e-3 * (1.0 + ref_scale):
        raise AssertionError(f"f32 Pallas kernel mismatch, max abs err={err_f32}")

    # bf16 basis path (v6e/v7x perf config); batch_tile=4 exercises a 2-step
    # grid plus batch/channel/seq padding (B=6 -> 8, C=4 -> 8, L=16 -> 128).
    out_bf16 = jax.block_until_ready(
        freq_decomp_moe(x, band_boundaries, gating_w, gating_b,
                        matmul_dtype=jnp.bfloat16, batch_tile=4))
    err_bf16 = float(jnp.max(jnp.abs(out_bf16 - ref)))
    if err_bf16 > 5e-2 * (1.0 + ref_scale):
        raise AssertionError(f"bf16 Pallas kernel mismatch, max abs err={err_bf16}")

    print("KERNEL_OK")
</pallas_src>

<mosaic_0001>
module attributes {stable_mosaic.version = 11 : i64} {
  func.func @freq_decomp_moe_kernel(%arg0: i32, %arg1: memref<6x8x128xf32, #tpu.memory_space<vmem>>, %arg2: memref<128x128xf32, #tpu.memory_space<vmem>>, %arg3: memref<128x128xf32, #tpu.memory_space<vmem>>, %arg4: memref<4x128xf32, #tpu.memory_space<vmem>>, %arg5: memref<1x4xf32, #tpu.memory_space<vmem>>, %arg6: memref<4x128xf32, #tpu.memory_space<vmem>>, %arg7: memref<6x8x128xf32, #tpu.memory_space<vmem>>) attributes {dimension_semantics = [#tpu.dimension_semantics<parallel>], iteration_bounds = array<i64: 1>, scalar_prefetch = 0 : i64, scratch_operands = 0 : i64, tpu.core_type = #tpu.core_type<tc>, window_params = [{transform_indices = @transform_0, window_bounds = array<i64: 6, 8, 128>}, {pipeline_mode = #tpu.pipeline_mode<synchronous>, transform_indices = @transform_1, window_bounds = array<i64: 128, 128>}, {pipeline_mode = #tpu.pipeline_mode<synchronous>, transform_indices = @transform_2, window_bounds = array<i64: 128, 128>}, {pipeline_mode = #tpu.pipeline_mode<synchronous>, transform_indices = @transform_3, window_bounds = array<i64: 4, 128>}, {pipeline_mode = #tpu.pipeline_mode<synchronous>, transform_indices = @transform_4, window_bounds = array<i64: 1, 4>}, {pipeline_mode = #tpu.pipeline_mode<synchronous>, transform_indices = @transform_5, window_bounds = array<i64: 4, 128>}, {transform_indices = @transform_6, window_bounds = array<i64: 6, 8, 128>}]} {
    %c0 = arith.constant 0 : index
    %c0_0 = arith.constant 0 : index
    %c0_1 = arith.constant 0 : index
    %0 = vector.load %arg1[%c0, %c0_0, %c0_1] : memref<6x8x128xf32, #tpu.memory_space<vmem>>, vector<6x8x128xf32>
    %cst = arith.constant dense<0.000000e+00> : vector<6x128xf32>
    %1 = vector.multi_reduction <add>, %0, %cst [1] : vector<6x8x128xf32> to vector<6x128xf32>
    %2 = vector.shape_cast %1 : vector<6x128xf32> to vector<6x1x128xf32>
    %3 = arith.mulf %0, %0 : vector<6x8x128xf32>
    %cst_2 = arith.constant dense<0.000000e+00> : vector<6x128xf32>
    %4 = vector.multi_reduction <add>, %3, %cst_2 [1] : vector<6x8x128xf32> to vector<6x128xf32>
    %5 = vector.shape_cast %4 : vector<6x128xf32> to vector<6x1x128xf32>
    %cst_3 = arith.constant 2.500000e-01 : f32
    %6 = vector.broadcast %cst_3 : f32 to vector<6x1x128xf32>
    %7 = arith.mulf %2, %6 : vector<6x1x128xf32>
    %8 = arith.mulf %2, %7 : vector<6x1x128xf32>
    %9 = arith.subf %5, %8 : vector<6x1x128xf32>
    %cst_4 = arith.constant 0.333333343 : f32
    %10 = vector.broadcast %cst_4 : f32 to vector<6x1x128xf32>
    %11 = arith.mulf %9, %10 : vector<6x1x128xf32>
    %cst_5 = arith.constant 9.99999974E-6 : f32
    %12 = vector.broadcast %cst_5 : f32 to vector<6x1x128xf32>
    %13 = arith.addf %11, %12 : vector<6x1x128xf32>
    %14 = math.rsqrt %13 : vector<6x1x128xf32>
    %15 = vector.broadcast %7 : vector<6x1x128xf32> to vector<6x8x128xf32>
    %16 = arith.subf %0, %15 : vector<6x8x128xf32>
    %17 = vector.broadcast %14 : vector<6x1x128xf32> to vector<6x8x128xf32>
    %18 = arith.mulf %16, %17 : vector<6x8x128xf32>
    %19 = tpu.iota {dimensions = array<i32: 1>} : vector<1x8x128xi32>
    %c4_i32 = arith.constant 4 : i32
    %20 = vector.broadcast %c4_i32 : i32 to vector<1x8x128xi32>
    %21 = arith.cmpi slt, %19, %20 : vector<1x8x128xi32>
    %22 = arith.extui %21 : vector<1x8x128xi1> to vector<1x8x128xi32>
    %23 = arith.sitofp %22 : vector<1x8x128xi32> to vector<1x8x128xf32>
    %24 = vector.broadcast %23 : vector<1x8x128xf32> to vector<6x8x128xf32>
    %25 = arith.mulf %18, %24 : vector<6x8x128xf32>
    %26 = vector.shape_cast %25 : vector<6x8x128xf32> to vector<48x128xf32>
    %c0_6 = arith.constant 0 : index
    %c0_7 = arith.constant 0 : index
    %27 = vector.load %arg2[%c0_6, %c0_7] : memref<128x128xf32, #tpu.memory_space<vmem>>, vector<128x128xf32>
    %cst_8 = arith.constant dense<0.000000e+00> : vector<48x128xf32>
    %28 = tpu.matmul %26, %27, %cst_8 {dimension_numbers = #tpu.dot_dimension_numbers<[1], [0], [0], [1], [0, 0, 1, 1], [], []>} : vector<48x128xf32>, vector<128x128xf32>, vector<48x128xf32> -> vector<48x128xf32>
    %29 = arith.mulf %28, %28 : vector<48x128xf32>
    %c119_i32 = arith.constant 119 : i32
    %30 = tpu.dynamic_rotate %29 by %c119_i32 dim 1 : vector<48x128xf32>, i32 -> vector<48x128xf32>
    %31 = arith.addf %29, %30 : vector<48x128xf32>
    %32 = math.sqrt %31 : vector<48x128xf32>
    %33 = vector.shape_cast %32 : vector<48x128xf32> to vector<6x8x128xf32>
    %cst_9 = arith.constant dense<0.000000e+00> : vector<6x128xf32>
    %34 = vector.multi_reduction <add>, %33, %cst_9 [1] : vector<6x8x128xf32> to vector<6x128xf32>
    %cst_10 = arith.constant 2.500000e-01 : f32
    %35 = vector.broadcast %cst_10 : f32 to vector<6x128xf32>
    %36 = arith.mulf %34, %35 : vector<6x128xf32>
    %c0_11 = arith.constant 0 : index
    %c0_12 = arith.constant 0 : index
    %37 = vector.load %arg4[%c0_11, %c0_12] : memref<4x128xf32, #tpu.memory_space<vmem>>, vector<4x128xf32>
    %cst_13 = arith.constant dense<0.000000e+00> : vector<6x4xf32>
    %38 = tpu.matmul %36, %37, %cst_13 {dimension_numbers = #tpu.dot_dimension_numbers<[1], [1], [0], [0], [0, 0, 1, 0], [], []>} : vector<6x128xf32>, vector<4x128xf32>, vector<6x4xf32> -> vector<6x4xf32>
    %c0_14 = arith.constant 0 : index
    %c0_15 = arith.constant 0 : index
    %39 = vector.load %arg5[%c0_14, %c0_15] : memref<1x4xf32, #tpu.memory_space<vmem>>, vector<1x4xf32>
    %40 = vector.broadcast %39 : vector<1x4xf32> to vector<6x4xf32>
    %41 = arith.addf %38, %40 : vector<6x4xf32>
    %cst_16 = arith.constant dense<0xFF800000> : vector<6xf32>
    %42 = vector.multi_reduction <maximumf>, %41, %cst_16 [1] : vector<6x4xf32> to vector<6xf32>
    %43 = vector.shape_cast %42 : vector<6xf32> to vector<6x1xf32>
    %44 = vector.broadcast %43 : vector<6x1xf32> to vector<6x4xf32>
    %45 = arith.subf %41, %44 : vector<6x4xf32>
    %46 = math.exp %45 : vector<6x4xf32>
    %cst_17 = arith.constant dense<0.000000e+00> : vector<6xf32>
    %47 = vector.multi_reduction <add>, %46, %cst_17 [1] : vector<6x4xf32> to vector<6xf32>
    %48 = vector.shape_cast %47 : vector<6xf32> to vector<6x1xf32>
    %49 = vector.broadcast %48 : vector<6x1xf32> to vector<6x4xf32>
    %50 = arith.divf %46, %49 : vector<6x4xf32>
    %c0_18 = arith.constant 0 : index
    %c0_19 = arith.constant 0 : index
    %51 = vector.load %arg6[%c0_18, %c0_19] : memref<4x128xf32, #tpu.memory_space<vmem>>, vector<4x128xf32>
    %cst_20 = arith.constant dense<0.000000e+00> : vector<6x128xf32>
    %52 = tpu.matmul %50, %51, %cst_20 {dimension_numbers = #tpu.dot_dimension_numbers<[1], [0], [0], [1], [0, 0, 1, 1], [], []>} : vector<6x4xf32>, vector<4x128xf32>, vector<6x128xf32> -> vector<6x128xf32>
    %53 = vector.shape_cast %28 : vector<48x128xf32> to vector<6x8x128xf32>
    %54 = vector.shape_cast %52 : vector<6x128xf32> to vector<6x1x128xf32>
    %55 = vector.broadcast %54 : vector<6x1x128xf32> to vector<6x8x128xf32>
    %56 = arith.mulf %53, %55 : vector<6x8x128xf32>
    %57 = vector.shape_cast %56 : vector<6x8x128xf32> to vector<48x128xf32>
    %c0_21 = arith.constant 0 : index
    %c0_22 = arith.constant 0 : index
    %58 = vector.load %arg3[%c0_21, %c0_22] : memref<128x128xf32, #tpu.memory_space<vmem>>, vector<128x128xf32>
    %cst_23 = arith.constant dense<0.000000e+00> : vector<48x128xf32>
    %59 = tpu.matmul %57, %58, %cst_23 {dimension_numbers = #tpu.dot_dimension_numbers<[1], [0], [0], [1], [0, 0, 1, 1], [], []>} : vector<48x128xf32>, vector<128x128xf32>, vector<48x128xf32> -> vector<48x128xf32>
    %60 = arith.mulf %13, %14 : vector<6x1x128xf32>
    %61 = vector.shape_cast %59 : vector<48x128xf32> to vector<6x8x128xf32>
    %62 = vector.broadcast %60 : vector<6x1x128xf32> to vector<6x8x128xf32>
    %63 = arith.mulf %61, %62 : vector<6x8x128xf32>
    %64 = vector.broadcast %7 : vector<6x1x128xf32> to vector<6x8x128xf32>
    %65 = arith.addf %63, %64 : vector<6x8x128xf32>
    %c0_24 = arith.constant 0 : index
    %c0_25 = arith.constant 0 : index
    %c0_26 = arith.constant 0 : index
    %66 = vector.load %arg7[%c0_24, %c0_25, %c0_26] : memref<6x8x128xf32, #tpu.memory_space<vmem>>, vector<6x8x128xf32>
    tpu.vector_store %arg7[%c0_24, %c0_25, %c0_26], %65 {strides = array<i32>} : memref<6x8x128xf32, #tpu.memory_space<vmem>>, vector<6x8x128xf32>,
    return
  }
  func.func @transform_0(%arg0: i32) -> (i32, i32, i32) {
    %c0_i32 = arith.constant 0 : i32
    %c0_i32_0 = arith.constant 0 : i32
    %c0_i32_1 = arith.constant 0 : i32
    return %arg0, %c0_i32, %c0_i32_0 : i32, i32, i32
  }
  func.func @transform_1(%arg0: i32) -> (i32, i32) {
    %c0_i32 = arith.constant 0 : i32
    %c0_i32_0 = arith.constant 0 : i32
    %c0_i32_1 = arith.constant 0 : i32
    return %c0_i32, %c0_i32_0 : i32, i32
  }
  func.func @transform_2(%arg0: i32) -> (i32, i32) {
    %c0_i32 = arith.constant 0 : i32
    %c0_i32_0 = arith.constant 0 : i32
    %c0_i32_1 = arith.constant 0 : i32
    return %c0_i32, %c0_i32_0 : i32, i32
  }
  func.func @transform_3(%arg0: i32) -> (i32, i32) {
    %c0_i32 = arith.constant 0 : i32
    %c0_i32_0 = arith.constant 0 : i32
    %c0_i32_1 = arith.constant 0 : i32
    return %c0_i32, %c0_i32_0 : i32, i32
  }
  func.func @transform_4(%arg0: i32) -> (i32, i32) {
    %c0_i32 = arith.constant 0 : i32
    %c0_i32_0 = arith.constant 0 : i32
    %c0_i32_1 = arith.constant 0 : i32
    return %c0_i32, %c0_i32_0 : i32, i32
  }
  func.func @transform_5(%arg0: i32) -> (i32, i32) {
    %c0_i32 = arith.constant 0 : i32
    %c0_i32_0 = arith.constant 0 : i32
    %c0_i32_1 = arith.constant 0 : i32
    return %c0_i32, %c0_i32_0 : i32, i32
  }
  func.func @transform_6(%arg0: i32) -> (i32, i32, i32) {
    %c0_i32 = arith.constant 0 : i32
    %c0_i32_0 = arith.constant 0 : i32
    %c0_i32_1 = arith.constant 0 : i32
    return %arg0, %c0_i32, %c0_i32_0 : i32, i32, i32
  }
}

</mosaic_0001>

<bundles_post_ra>
// kernel: freq_decomp_moe.1
= control target key start
LH: loop header
LB: loop body
LE: loop exit
PB: predicated region body
PF: predicated region fallthrough
CT: control target
= control target key end

     0   :  { %v1034_v3 = vmov 0.0   ;;  %vm1036_vm1 = vmmov 0   ;;  %vm399_vm14 = vcmask 1041409   ;;  %vm401_vm15 = vcmask 1042434   ;;  %s1382_s1 = inlined_call_operand.vmem [shape: f32[128,128], index: 1, kind: input, shape index: {}]   ;;  %s1383_s0 = inlined_call_operand.vmem [shape: f32[6,8,128], index: 0, kind: input, shape index: {}]   ;;  %s1384_s3 = inlined_call_operand.vmem [shape: f32[4,128], index: 3, kind: input, shape index: {}]   ;;  %s1385_s4 = inlined_call_operand.vmem [shape: f32[1,4], index: 4, kind: input, shape index: {}]   ;;  %s1386_s5 = inlined_call_operand.vmem [shape: f32[4,128], index: 5, kind: input, shape index: {}]   ;;  %s1387_s2 = inlined_call_operand.vmem [shape: f32[128,128], index: 2, kind: input, shape index: {}]   ;;  %s1388_s6 = inlined_call_operand.vmem [shape: f32[6,8,128], index: 6, kind: output, shape index: {}]  }
   0x1   :  { %v166_v0 = vld [vmem:[%s1382_s1] sm:$0xff]  ;;  %v167_v1 = vld [vmem:[%s1382_s1 + $0x8] sm:$0xff]  ;;  %v168_v2 = vld [vmem:[%s1382_s1 + $0x10] sm:$0xff]  ;;  %892 = vmatprep.subr.mxu1 %v1034_v3  ;;  %894 = vmatprep.mubr.msk.f32.mxu1 %vm1036_vm1, %v1034_v3 }
   0x2   :  { %v938_v4 = vpack.c.bf16 %v167_v1, %v166_v0  ;;  %v169_v5 = vld [vmem:[%s1382_s1 + $0x18] sm:$0xff]  ;;  %v170_v6 = vld [vmem:[%s1382_s1 + $0x20] sm:$0xff]  ;;  %v171_v7 = vld [vmem:[%s1382_s1 + $0x28] sm:$0xff] }
   0x3   :  { %v942_v8 = vpack.c.bf16 %v169_v5, %v168_v2  ;;  %v172_v9 = vld [vmem:[%s1382_s1 + $0x30] sm:$0xff]  ;;  %v173_v10 = vld [vmem:[%s1382_s1 + $0x38] sm:$0xff]  ;;  %v174_v11 = vld [vmem:[%s1382_s1 + $0x40] sm:$0xff]  ;;  %v946_v15 = vpack.c.bf16 %v171_v7, %v170_v6 }
   0x4   :  { %939 = vmatprep.subr.bf16.mxu0 %v938_v4  ;;  %v175_v12 = vld [vmem:[%s1382_s1 + $0x48] sm:$0xff]  ;;  %v176_v13 = vld [vmem:[%s1382_s1 + $0x50] sm:$0xff]  ;;  %v177_v14 = vld [vmem:[%s1382_s1 + $0x58] sm:$0xff]  ;;  %v950_v16 = vpack.c.bf16 %v173_v10, %v172_v9 }
   0x5   :  { %941 = vmatpush3.bf16.msra.mxu0 %v938_v4  ;;  %v1110_v17 = vpack.c.bf16 %v175_v12, %v174_v11  ;;  %v1115_v18 = vld [vmem:[%s1383_s0] sm:$0xff]  ;;  %v1120_v19 = vld [vmem:[%s1383_s0 + $0x8] sm:$0xff]  ;;  %v1122_v20 = vpack.c.bf16 %v177_v14, %v176_v13  ;;  %v1131_v24 = vld [vmem:[%s1383_s0 + $0x10] sm:$0xff] }
   0x6   :  { %943 = vmatprep.subr.bf16.mxu0 %v942_v8  ;;  %v29_v21 = vrot.slane %v1115_v18, 4  ;;  %v65_v22 = vmul.f32 %v1115_v18, %v1115_v18  ;;  %v35_v23 = vrot.slane %v1120_v19, 4  ;;  %v1136_v25 = vld [vmem:[%s1383_s0 + $0x18] sm:$0xff]  ;;  %v66_v26 = vmul.f32 %v1120_v19, %v1120_v19  ;;  %v178_v7 = vld [vmem:[%s1382_s1 + $0x60] sm:$0xff]  ;;  %v180_v13 = vld [vmem:[%s1382_s1 + $0x70] sm:$0xff] }
   0x7   :  { %v41_v27 = vrot.slane %v1131_v24, 4  ;;  %v67_v28 = vmul.f32 %v1131_v24, %v1131_v24  ;;  %v47_v29 = vrot.slane %v1136_v25, 4  ;;  %v68_v33 = vmul.f32 %v1136_v25, %v1136_v25  ;;  %v181_v14 = vld [vmem:[%s1382_s1 + $0x78] sm:$0xff] }
   0x8   :  { %v30_v30 = vadd.f32 %v29_v21, %v1115_v18  ;;  %v71_v31 = vrot.slane %v65_v22, 4  ;;  %v36_v32 = vadd.f32 %v35_v23, %v1120_v19  ;;  %v77_v34 = vrot.slane %v66_v26, 4  ;;  %v1174_v23 = vld [vmem:[%s1383_s0 + $0x20] sm:$0xff] }
   0x9   :  { %945 = vmatpush3.bf16.msra.mxu0 %v942_v8  ;;  %v42_v35 = vadd.f32 %v41_v27, %v1131_v24  ;;  %v83_v36 = vrot.slane %v67_v28, 4  ;;  %v48_v37 = vadd.f32 %v47_v29, %v1136_v25  ;;  %v89_v41 = vrot.slane %v68_v33, 4  ;;  %v179_v8 = vld [vmem:[%s1382_s1 + $0x68] sm:$0xff] }
   0xa   :  { %947 = vmatprep.subr.bf16.mxu0 %v946_v15  ;;  %v31_v38 = vrot.slane %v30_v30, 2  ;;  %v72_v39 = vadd.f32 %v71_v31, %v65_v22  ;;  %v37_v40 = vrot.slane %v36_v32, 2  ;;  %v78_v42 = vadd.f32 %v77_v34, %v66_v26  ;;  %v1182_v29 = vld [vmem:[%s1383_s0 + $0x28] sm:$0xff]  ;;  %s1035_s0 = smov 119  }
   0xb   :  { %v43_v43 = vrot.slane %v42_v35, 2  ;;  %v84_v44 = vadd.f32 %v83_v36, %v67_v28  ;;  %v49_v45 = vrot.slane %v48_v37, 2  ;;  %v90_v49 = vadd.f32 %v89_v41, %v68_v33 }
   0xc   :  { %v32_v46 = vadd.f32 %v31_v38, %v30_v30  ;;  %v73_v47 = vrot.slane %v72_v39, 2  ;;  %v38_v48 = vadd.f32 %v37_v40, %v36_v32  ;;  %v79_v50 = vrot.slane %v78_v42, 2 }
   0xd   :  { %949 = vmatpush3.bf16.msra.mxu0 %v946_v15  ;;  %v44_v51 = vadd.f32 %v43_v43, %v42_v35  ;;  %v85_v52 = vrot.slane %v84_v44, 2  ;;  %v50_v53 = vadd.f32 %v49_v45, %v48_v37  ;;  %v91_v57 = vrot.slane %v90_v49, 2 }
   0xe   :  { %951 = vmatprep.subr.bf16.mxu0 %v950_v16  ;;  %v33_v54 = vrot.slane %v32_v46, 1  ;;  %v74_v55 = vadd.f32 %v73_v47, %v72_v39  ;;  %v39_v56 = vrot.slane %v38_v48, 1  ;;  %v80_v58 = vadd.f32 %v79_v50, %v78_v42 }
   0xf   :  { %v45_v59 = vrot.slane %v44_v51, 1  ;;  %v86_v60 = vadd.f32 %v85_v52, %v84_v44  ;;  %v51_v61 = vrot.slane %v50_v53, 1  ;;  %v92_v1 = vadd.f32 %v91_v57, %v90_v49 }
  0x10   :  { %v34_v62 = vadd.f32 %v33_v54, %v32_v46  ;;  %v75_v63 = vrot.slane %v74_v55, 1  ;;  %v40_v0 = vadd.f32 %v39_v56, %v38_v48  ;;  %v81_v2 = vrot.slane %v80_v58, 1 }
  0x11   :  { %953 = vmatpush3.bf16.msra.mxu0 %v950_v16  ;;  %v46_v4 = vadd.f32 %v45_v59, %v44_v51  ;;  %v87_v5 = vrot.slane %v86_v60, 1  ;;  %v52_v6 = vadd.f32 %v51_v61, %v50_v53  ;;  %v93_v12 = vrot.slane %v92_v1, 1 }
  0x12   :  { %955 = vmatprep.subr.bf16.mxu0 %v1110_v17  ;;  %v76_v9 = vadd.f32 %v75_v63, %v74_v55  ;;  %v1157_v10 = vmul.f32 0.25, %v34_v62  ;;  %v1159_v11 = vmul.f32 0.25, %v40_v0  ;;  %v82_v15 = vadd.f32 %v81_v2, %v80_v58 }
  0x13   :  { %v88_v16 = vadd.f32 %v87_v5, %v86_v60  ;;  %v1167_v21 = vmul.f32 0.25, %v46_v4  ;;  %v1169_v22 = vmul.f32 0.25, %v52_v6  ;;  %v155_v27 = vlaneseq }
  0x14   :  { %v113_v26 = vmul.f32 %v1157_v10, %v34_v62  ;;  %v114_v28 = vmul.f32 %v1159_v11, %v40_v0  ;;  %v962_v30 = vpack.c.bf16 %v179_v8, %v178_v7  ;;  %v94_v32 = vadd.f32 %v93_v12, %v92_v1 }
  0x15   :  { %957 = vmatpush3.bf16.msra.mxu0 %v1110_v17  ;;  %v115_v31 = vmul.f32 %v1167_v21, %v46_v4  ;;  %v116_v33 = vmul.f32 %v1169_v22, %v52_v6  ;;  %v966_v34 = vpack.c.bf16 %v181_v14, %v180_v13  ;;  %v53_v36 = vrot.slane %v1174_v23, 4 }
  0x16   :  { %959 = vmatprep.subr.bf16.mxu0 %v1122_v20  ;;  %v119_v17 = vsub.f32 %v76_v9, %v113_v26  ;;  %v120_v35 = vsub.f32 %v82_v15, %v114_v28  ;;  %v69_v39 = vmul.f32 %v1174_v23, %v1174_v23  ;;  %v59_v40 = vrot.slane %v1182_v29, 4 }
  0x17   :  { %v121_v37 = vsub.f32 %v88_v16, %v115_v31  ;;  %v122_v38 = vsub.f32 %v94_v32, %v116_v33  ;;  %v54_v43 = vadd.f32 %v53_v36, %v1174_v23  ;;  %v70_v44 = vmul.f32 %v1182_v29, %v1182_v29 }
  0x18   :  { %v125_v41 = vmul.f32 0.33333334, %v119_v17  ;;  %v126_v42 = vmul.f32 0.33333334, %v120_v35  ;;  %v95_v47 = vrot.slane %v69_v39, 4  ;;  %v60_v48 = vadd.f32 %v59_v40, %v1182_v29 }
  0x19   :  { %961 = vmatpush3.bf16.msra.mxu0 %v1122_v20  ;;  %v127_v45 = vmul.f32 0.33333334, %v121_v37  ;;  %v128_v46 = vmul.f32 0.33333334, %v122_v38  ;;  %v55_v51 = vrot.slane %v54_v43, 2  ;;  %v101_v52 = vrot.slane %v70_v44, 4 }
  0x1a   :  { %963 = vmatprep.subr.bf16.mxu0 %v962_v30  ;;  %v1196_v49 = vadd.f32 1e-05, %v125_v41  ;;  %v1198_v50 = vadd.f32 1e-05, %v126_v42  ;;  %v96_v54 = vadd.f32 %v95_v47, %v69_v39  ;;  %v61_v55 = vrot.slane %v60_v48, 2 }
  0x1b   :  { %v1200_v20 = vadd.f32 1e-05, %v127_v45  ;;  %v1202_v53 = vadd.f32 1e-05, %v128_v46  ;;  %v56_v56 = vadd.f32 %v55_v51, %v54_v43  ;;  %v102_v57 = vadd.f32 %v101_v52, %v70_v44 }
  0x1c   :  { %1006 = vrsqrt.f32 %v1196_v49  ;;  %v97_v58 = vrot.slane %v96_v54, 2  ;;  %v62_v59 = vadd.f32 %v61_v55, %v60_v48  ;;  %v1207_v62 = vshrl.u32 %v155_v27, 7 }
  0x1d   :  { %965 = vmatpush3.bf16.msra.mxu0 %v962_v30  ;;  %1008 = vrsqrt.f32 %v1198_v50  ;;  %v57_v60 = vrot.slane %v56_v56, 1  ;;  %v103_v61 = vrot.slane %v102_v57, 2  ;;  %v143_v8 = vsub.f32 %v1115_v18, %v1157_v10 }
  0x1e   :  { %967 = vmatprep.subr.bf16.mxu0 %v966_v34  ;;  %1010 = vrsqrt.f32 %v1200_v20  ;;  %v98_v63 = vadd.f32 %v97_v58, %v96_v54  ;;  %v63_v0 = vrot.slane %v62_v59, 1  ;;  %vm157_vm0 = vcmp.lt.s32.totalorder %v1207_v62, 4 }
  0x1f   :  { %1012 = vrsqrt.f32 %v1202_v53  ;;  %v58_v1 = vadd.f32 %v57_v60, %v56_v56  ;;  %v104_v2 = vadd.f32 %v103_v61, %v102_v57  ;;  %v144_v13 = vsub.f32 %v1120_v19, %v1159_v11 }
  0x20   :  { %v99_v4 = vrot.slane %v98_v63, 1  ;;  %v64_v5 = vadd.f32 %v63_v0, %v62_v59  ;;  %v145_v16 = vsub.f32 %v1131_v24, %v1167_v21  ;;  %v794_v18 = vsel %vm157_vm0, 1.0, %v1034_v3 }
  0x21   :  { %969 = vmatpush3.bf16.msra.mxu0 %v966_v34  ;;  %v1211_v6 = vmul.f32 0.25, %v58_v1  ;;  %v105_v7 = vrot.slane %v104_v2, 1  ;;  %v146_v28 = vsub.f32 %v1136_v25, %v1169_v22  ;;  %vm403_vm0 = vcmask 1043459  }
  0x22   :  { %887 = vmatprep.subr.mxu0 %v1034_v3  ;;  %v100_v9 = vadd.f32 %v99_v4, %v98_v63  ;;  %v1216_v12 = vmul.f32 0.25, %v64_v5 }
  0x23   :  { %v117_v14 = vmul.f32 %v1211_v6, %v58_v1  ;;  %v106_v15 = vadd.f32 %v105_v7, %v104_v2  ;;  %v147_v43 = vsub.f32 %v1174_v23, %v1211_v6  ;;  %v385_v1 = vld [vmem:[%s1384_s3] sm:$0xf] }
  0x24   :  { %v118_v26 = vmul.f32 %v1216_v12, %v64_v5  ;;  %v148_v44 = vsub.f32 %v1182_v29, %v1216_v12 }
  0x25   :  { %v123_v30 = vsub.f32 %v100_v9, %v117_v14 }
  0x26   :  { %v1224_v27 = vpop.eup %1006  ;;  %v124_v32 = vsub.f32 %v106_v15, %v118_v26 }
  0x27   :  { %v1229_v31 = vpop.eup %1008  ;;  %v149_v19 = vmul.f32 %v1224_v27, %v143_v8  ;;  %v129_v24 = vmul.f32 0.33333334, %v123_v30 }
  0x28   :  { %v1232_v33 = vpop.eup %1010  ;;  %v150_v34 = vmul.f32 %v1229_v31, %v144_v13  ;;  %v130_v37 = vmul.f32 0.33333334, %v124_v32 }
  0x29   :  { %v1235_v17 = vpop.eup %1012  ;;  %v160_v35 = vmul.f32 %v794_v18, %v149_v19  ;;  %v151_v36 = vmul.f32 %v1232_v33, %v145_v16  ;;  %v1239_v39 = vadd.f32 1e-05, %v129_v24 }
  0x2a   :  { %v161_v38 = vmul.f32 %v794_v18, %v150_v34  ;;  %v152_v25 = vmul.f32 %v1235_v17, %v146_v28  ;;  %v1241_v41 = vadd.f32 1e-05, %v130_v37 }
  0x2b   :  { %878 = vmatprep.mubr.f32.mxu0 %v160_v35  ;;  %v162_v40 = vmul.f32 %v794_v18, %v151_v36  ;;  %1014 = vrsqrt.f32 %v1239_v39 }
  0x2c   :  { %879 = vmatmul.mubr.f32.vlgmr.msra.gmra.mrb[0].mxu0 %v161_v38  ;;  %v163_v42 = vmul.f32 %v794_v18, %v152_v25  ;;  %1016 = vrsqrt.f32 %v1241_v41 }
  0x2d   :  { %881 = vmatprep.mubr.f32.mxu0 %v162_v40  ;;  %888 = vmatpush3.xpose.msra.mxu0 %v385_v1 }
  0x30   :  { %882 = vmatmul.mubr.f32.gmra.mrb[2].mxu0 %v163_v42 }
  0x35   :  { %v1249_v45 = vpop.eup %1014 }
  0x36   :  { %v1251_v46 = vpop.eup %1016  ;;  %v153_v47 = vmul.f32 %v1249_v45, %v147_v43 }
  0x37   :  { %v154_v48 = vmul.f32 %v1251_v46, %v148_v44 }
  0x38   :  { %v164_v51 = vmul.f32 %v794_v18, %v153_v47 }
  0x39   :  { %v165_v52 = vmul.f32 %v794_v18, %v154_v48 }
  0x3a   :  { %884 = vmatprep.mubr.f32.mxu0 %v164_v51 }
  0x3b   :  { %885 = vmatmul.mubr.f32.gmra.mrb[4].mxu0 %v165_v52 }
  0x3c   :  { %889 = vmatprep.mubr.msk.f32.mxu0 %vm1036_vm1, %v1034_v3  ;;  %vm405_vm1 = vcmask 1044484  }
  0xff   :  { %v1255_v54 = vpop.f32.mrb[0].mxu0 }
 0x100   :  { %v1257_v55 = vpop.f32.mrb[1].mxu0  ;;  %v278_v23 = vmul.f32 %v1255_v54, %v1255_v54 }
 0x101   :  { %v277_v56 = vmul.f32 %v1257_v55, %v1257_v55 }
 0x102   :  { %285 = vrot.lane.b32.xlu0 %v278_v23, %s1035_s0 }
 0x103   :  { %v1261_v29 = vpop.f32.mrb[2].mxu0 }
 0x104   :  { %v1265_v57 = vpop.f32.mrb[3].mxu0  ;;  %v280_v58 = vmul.f32 %v1261_v29, %v1261_v29 }
 0x105   :  { %v279_v59 = vmul.f32 %v1265_v57, %v1265_v57 }
 0x106   :  { %283 = vrot.lane.b32.xlu0 %v277_v56, %s1035_s0  ;;  %289 = vrot.lane.b32.xlu1 %v280_v58, %s1035_s0 }
 0x10a   :  { %287 = vrot.lane.b32.xlu1 %v279_v59, %s1035_s0 }
 0x10e   :  { %v1271_v60 = vpop.f32.mrb[4].mxu0 }
 0x10f   :  { %v282_v61 = vmul.f32 %v1271_v60, %v1271_v60  ;;  %v1275_v63 = vpop.f32.mrb[5].mxu0 }
 0x110   :  { %v281_v0 = vmul.f32 %v1275_v63, %v1275_v63 }
 0x111   :  { %293 = vrot.lane.b32.xlu1 %v282_v61, %s1035_s0 }
 0x112   :  { %291 = vrot.lane.b32.xlu0 %v281_v0, %s1035_s0 }
 0x174   :  { %v286_v2 = vpop.permute.xlu0 %285 }
 0x175   :  { %v296_v4 = vadd.f32 %v286_v2, %v278_v23 }
 0x177   :  { %1018 = vrsqrt.f32 %v296_v4  ;;  %vm310_vm2 = vcmp.eq.f32.partialorder %v296_v4, inf  ;;  %v313_v26 = vand.u32 2147483648, %v296_v4  ;;  %vm312_vm3 = vcmp.eq.f32.partialorder %v296_v4, 0.0 }
 0x178   :  { %v284_v5 = vpop.permute.xlu0 %283  ;;  %v290_v7 = vpop.permute.xlu1 %289 }
 0x179   :  { %v295_v8 = vadd.f32 %v284_v5, %v277_v56  ;;  %v298_v9 = vadd.f32 %v290_v7, %v280_v58 }
 0x17b   :  { %1020 = vrsqrt.f32 %v295_v8  ;;  %vm303_vm4 = vcmp.eq.f32.partialorder %v295_v8, inf  ;;  %vm305_vm5 = vcmp.eq.f32.partialorder %v295_v8, 0.0  ;;  %v306_v37 = vand.u32 2147483648, %v295_v8 }
 0x17c   :  { %1022 = vrsqrt.f32 %v298_v9  ;;  %v288_v13 = vpop.permute.xlu1 %287  ;;  %vm324_vm6 = vcmp.eq.f32.partialorder %v298_v9, inf  ;;  %v327_v42 = vand.u32 2147483648, %v298_v9  ;;  %vm326_vm7 = vcmp.eq.f32.partialorder %v298_v9, 0.0 }
 0x17d   :  { %v297_v14 = vadd.f32 %v288_v13, %v279_v59 }
 0x17f   :  { %1024 = vrsqrt.f32 %v297_v14  ;;  %vm317_vm8 = vcmp.eq.f32.partialorder %v297_v14, inf  ;;  %v320_v23 = vand.u32 2147483648, %v297_v14  ;;  %vm319_vm9 = vcmp.eq.f32.partialorder %v297_v14, 0.0 }
 0x181   :  { %v1019_v15 = vpop.eup %1018 }
 0x182   :  { %v309_v16 = vmul.f32 %v1019_v15, %v296_v4 }
 0x183   :  { %v294_v3 = vpop.permute.xlu1 %293 }
 0x184   :  { %v311_v18 = vsel %vm310_vm2, %v296_v4, %v309_v16  ;;  %v292_v19 = vpop.permute.xlu0 %291  ;;  %v300_v32 = vadd.f32 %v294_v3, %v282_v61  ;;  %vm407_vm2 = vcmask 1045509  }
 0x185   :  { %v1021_v28 = vpop.eup %1020  ;;  %v314_v30 = vsel %vm312_vm3, %v313_v26, %v311_v18  ;;  %v299_v36 = vadd.f32 %v292_v19, %v281_v0  ;;  %vm480_vm3 = vcmask 29696  }
 0x186   :  { %v1023_v34 = vpop.eup %1022  ;;  %v349_v24 = vrot.slane %v314_v30, 4  ;;  %v302_v35 = vmul.f32 %v1021_v28, %v295_v8  ;;  %1026 = vrsqrt.f32 %v300_v32  ;;  %vm338_vm10 = vcmp.eq.f32.partialorder %v300_v32, inf }
 0x187   :  { %v323_v38 = vmul.f32 %v1023_v34, %v298_v9  ;;  %1028 = vrsqrt.f32 %v299_v36  ;;  %v341_v26 = vand.u32 2147483648, %v300_v32  ;;  %vm331_vm11 = vcmp.eq.f32.partialorder %v299_v36, inf }
 0x188   :  { %v350_v25 = vadd.f32 %v349_v24, %v314_v30  ;;  %v304_v40 = vsel %vm303_vm4, %v295_v8, %v302_v35  ;;  %v334_v30 = vand.u32 2147483648, %v299_v36  ;;  %vm340_vm12 = vcmp.eq.f32.partialorder %v300_v32, 0.0 }
 0x189   :  { %v1025_v43 = vpop.eup %1024  ;;  %v307_v44 = vsel %vm305_vm5, %v306_v37, %v304_v40  ;;  %v325_v47 = vsel %vm324_vm6, %v298_v9, %v323_v38  ;;  %vm333_vm13 = vcmp.eq.f32.partialorder %v299_v36, 0.0  ;;  %vm497_vm4 = vcmask 1043456  }
 0x18a   :  { %v343_v48 = vrot.slane %v307_v44, 4  ;;  %v316_v51 = vmul.f32 %v1025_v43, %v297_v14  ;;  %v328_v52 = vsel %vm326_vm7, %v327_v42, %v325_v47  ;;  %v351_v61 = vrot.slane %v350_v25, 2 }
 0x18b   :  { %v361_v56 = vrot.slane %v328_v52, 4  ;;  %vm493_vm5 = vcmask 31744  }
 0x18c   :  { %v344_v58 = vadd.f32 %v343_v48, %v307_v44  ;;  %v318_v59 = vsel %vm317_vm8, %v297_v14, %v316_v51  ;;  %v352_v7 = vadd.f32 %v351_v61, %v350_v25 }
 0x18d   :  { %v321_v0 = vsel %vm319_vm9, %v320_v23, %v318_v59  ;;  %v362_v1 = vadd.f32 %v361_v56, %v328_v52 }
 0x18e   :  { %v355_v2 = vrot.slane %v321_v0, 4  ;;  %v345_v4 = vrot.slane %v344_v58, 2  ;;  %v353_v19 = vrot.slane %v352_v7, 1 }
 0x18f   :  { %v363_v13 = vrot.slane %v362_v1, 2 }
 0x190   :  { %v346_v5 = vadd.f32 %v345_v4, %v344_v58  ;;  %v356_v8 = vadd.f32 %v355_v2, %v321_v0  ;;  %v1027_v15 = vpop.eup %1026  ;;  %v354_v44 = vadd.f32 %v353_v19, %v352_v7 }
 0x191   :  { %v1029_v9 = vpop.eup %1028  ;;  %v337_v16 = vmul.f32 %v1027_v15, %v300_v32  ;;  %v364_v24 = vadd.f32 %v363_v13, %v362_v1 }
 0x192   :  { %v347_v18 = vrot.slane %v346_v5, 1  ;;  %v357_v3 = vrot.slane %v356_v8, 2  ;;  %v330_v28 = vmul.f32 %v1029_v9, %v299_v36  ;;  %v380_v0 = vmul.f32 0.25, %v354_v44 }
 0x193   :  { %v339_v14 = vsel %vm338_vm10, %v300_v32, %v337_v16  ;;  %v365_v48 = vrot.slane %v364_v24, 1 }
 0x194   :  { %v358_v34 = vadd.f32 %v357_v3, %v356_v8  ;;  %v332_v35 = vsel %vm331_vm11, %v299_v36, %v330_v28  ;;  %v342_v37 = vsel %vm340_vm12, %v341_v26, %v339_v14  ;;  %v348_v25 = vadd.f32 %v347_v18, %v346_v5  ;;  %v795_v3 = vld [vmem:[%s1385_s4] ss:$0 sm:$0xff] }
 0x195   :  { %v335_v38 = vsel %vm333_vm13, %v334_v30, %v332_v35  ;;  %v373_v42 = vrot.slane %v342_v37, 4  ;;  %v366_v59 = vadd.f32 %v365_v48, %v364_v24  ;;  %v658_v48 = vld [vmem:[%s1387_s2 + $0x18] sm:$0xff] }
 0x196   :  { %v359_v40 = vrot.slane %v358_v34, 1  ;;  %v367_v43 = vrot.slane %v335_v38, 4  ;;  %v379_v56 = vmul.f32 0.25, %v348_v25  ;;  %v492_v25 = vld [vmem:[%s1386_s5] sm:$0xf] }
 0x197   :  { %v374_v51 = vadd.f32 %v373_v42, %v342_v37  ;;  %v382_v8 = vmul.f32 0.25, %v366_v59  ;;  %893 = vmatpush3.msk.msra.mxu1 %vm497_vm4, %v492_v25  ;;  %v656_v42 = vld [vmem:[%s1387_s2 + $0x8] sm:$0xff]  ;;  %v661_v59 = vld [vmem:[%s1387_s2 + $0x30] sm:$0xff] }
 0x198   :  { %v360_v47 = vadd.f32 %v359_v40, %v358_v34  ;;  %v368_v52 = vadd.f32 %v367_v43, %v335_v38  ;;  %v400_v2 = vsel %vm399_vm14, %v380_v0, %v379_v56  ;;  %v655_v40 = vld [vmem:[%s1387_s2] sm:$0xff] }
 0x199   :  { %v375_v23 = vrot.slane %v374_v51, 2  ;;  %v970_v43 = vpack.c.bf16 %v656_v42, %v655_v40  ;;  %v659_v56 = vld [vmem:[%s1387_s2 + $0x20] sm:$0xff] }
 0x19a   :  { %v369_v58 = vrot.slane %v368_v52, 2  ;;  %v381_v32 = vmul.f32 0.25, %v360_v47  ;;  %v657_v47 = vld [vmem:[%s1387_s2 + $0x10] sm:$0xff] }
 0x19b   :  { %v376_v61 = vadd.f32 %v375_v23, %v374_v51  ;;  %971 = vmatprep.subr.bf16.mxu1 %v970_v43  ;;  %v974_v23 = vpack.c.bf16 %v658_v48, %v657_v47 }
 0x19c   :  { %v370_v36 = vadd.f32 %v369_v58, %v368_v52  ;;  %v402_v5 = vsel %vm401_vm15, %v381_v32, %v400_v2  ;;  %v660_v58 = vld [vmem:[%s1387_s2 + $0x28] sm:$0xff] }
 0x19d   :  { %v377_v1 = vrot.slane %v376_v61, 1  ;;  %v404_v9 = vsel %vm403_vm0, %v382_v8, %v402_v5  ;;  %v978_v32 = vpack.c.bf16 %v660_v58, %v659_v56  ;;  %v666_v5 = vld [vmem:[%s1387_s2 + $0x58] sm:$0xff]  ;;  %v667_v8 = vld [vmem:[%s1387_s2 + $0x60] sm:$0xff] }
 0x19e   :  { %v371_v4 = vrot.slane %v370_v36, 1 }
 0x19f   :  { %v378_v7 = vadd.f32 %v377_v1, %v376_v61  ;;  %v662_v61 = vld [vmem:[%s1387_s2 + $0x38] sm:$0xff]  ;;  %v664_v1 = vld [vmem:[%s1387_s2 + $0x48] sm:$0xff] }
 0x1a0   :  { %v372_v13 = vadd.f32 %v371_v4, %v370_v36  ;;  %v982_v0 = vpack.c.bf16 %v662_v61, %v661_v59  ;;  %v663_v36 = vld [vmem:[%s1387_s2 + $0x40] sm:$0xff]  ;;  %v665_v4 = vld [vmem:[%s1387_s2 + $0x50] sm:$0xff] }
 0x1a1   :  { %v384_v15 = vmul.f32 0.25, %v378_v7  ;;  %v986_v2 = vpack.c.bf16 %v664_v1, %v663_v36  ;;  %v990_v7 = vpack.c.bf16 %v666_v5, %v665_v4 }
 0x1a2   :  { %v383_v16 = vmul.f32 0.25, %v372_v13  ;;  %v668_v13 = vld [vmem:[%s1387_s2 + $0x68] sm:$0xff] }
 0x1a4   :  { %v406_v26 = vsel %vm405_vm1, %v383_v16, %v404_v9  ;;  %v669_v9 = vld [vmem:[%s1387_s2 + $0x70] sm:$0xff]  ;;  %v670_v16 = vld [vmem:[%s1387_s2 + $0x78] sm:$0xff] }
 0x1a5   :  { %v408_v18 = vsel %vm407_vm2, %v384_v15, %v406_v26  ;;  %v994_v15 = vpack.c.bf16 %v668_v13, %v667_v8  ;;  %v998_v26 = vpack.c.bf16 %v670_v16, %v669_v9 }
 0x1a6   :  { %890 = vmatmul.mubr.f32.vlgmr.msra.gmra.mrb[6].mxu0 %v408_v18  ;;  %v1037_v18 = vmov 1966171168  }
 0x279   :  { %v476_v28 = vpop.f32.mrb[6].mxu0 }
 0x27a   :  { %v477_v30 = vadd.f32 %v795_v3, %v476_v28  ;;  %v891_v14 = vpop.f32.mrb[7].mxu0  ;;  %v574_v3 = vunpack.c.l.s4 %v1037_v18 }
 0x27c   :  { %v481_v19 = vsel %vm480_vm3, %v477_v30, -inf  ;;  %v575_v28 = vunpack.c.0.s8 %v574_v3 }
 0x27d   :  { %482 = vmax.xlane.f32.xlu0 %v481_v19 }
 0x30a   :  { %v483_v34 = vpop.xlane.xlu0 %482 }
 0x30b   :  { %v484_v24 = vsub.f32 %v477_v30, %v483_v34  ;;  %v578_v30 = vsub.s32 %v575_v28, %v1207_v62 }
 0x30d   :  { %v485_v35 = vmul.f32 1.442695, %v484_v24 }
 0x30f   :  { %1030 = vpow2.f32 %v485_v35  ;;  %v621_v35 = vsub.s32 0, %v1207_v62 }
 0x319   :  { %v1031_v37 = vpop.eup %1030 }
 0x31a   :  { %v487_v38 = vsel %vm480_vm3, %v1031_v37, 0.0 }
 0x31b   :  { %488 = vadd.xlane.f32.xlu1 %v487_v38 }
 0x3a8   :  { %v489_v44 = vpop.xlane.xlu1 %488 }
 0x3a9   :  { %1032 = vrcp.f32 %v489_v44 }
 0x3b3   :  { %v1033_v51 = vpop.eup %1032 }
 0x3b4   :  { %v491_v52 = vmul.f32 %v1033_v51, %v1031_v37 }
 0x3b6   :  { %895 = vmatmul.mubr.msk.f32.vlgmr.msra.gmra.mrb[0].mxu1 %vm493_vm5, %v491_v52 }
 0x3b7   :  { %973 = vmatpush3.bf16.msra.mxu1 %v970_v43 }
 0x3b8   :  { %975 = vmatprep.subr.bf16.mxu1 %v974_v23 }
 0x3bb   :  { %977 = vmatpush3.bf16.msra.mxu1 %v974_v23 }
 0x3bc   :  { %979 = vmatprep.subr.bf16.mxu1 %v978_v32 }
 0x3bf   :  { %981 = vmatpush3.bf16.msra.mxu1 %v978_v32 }
 0x3c0   :  { %983 = vmatprep.subr.bf16.mxu1 %v982_v0 }
 0x3c3   :  { %985 = vmatpush3.bf16.msra.mxu1 %v982_v0 }
 0x3c4   :  { %987 = vmatprep.subr.bf16.mxu1 %v986_v2 }
 0x3c7   :  { %989 = vmatpush3.bf16.msra.mxu1 %v986_v2 }
 0x3c8   :  { %991 = vmatprep.subr.bf16.mxu1 %v990_v7 }
 0x3cb   :  { %993 = vmatpush3.bf16.msra.mxu1 %v990_v7 }
 0x3cc   :  { %995 = vmatprep.subr.bf16.mxu1 %v994_v15 }
 0x3cf   :  { %997 = vmatpush3.bf16.msra.mxu1 %v994_v15 }
 0x3d0   :  { %999 = vmatprep.subr.bf16.mxu1 %v998_v26 }
 0x3d3   :  { %1001 = vmatpush3.bf16.msra.mxu1 %v998_v26 }
 0x489   :  { %v567_v14 = vpop.f32.mrb[0].mxu1 }
 0x48a   :  { %v572_v19 = vcombine.high %v567_v14, %v567_v14  ;;  %v579_v34 = vrot.slane %v567_v14, %v578_v30  ;;  %v896_v24 = vpop.f32.mrb[1].mxu1 }
 0x48c   :  { %v586_v37 = vrot.slane %v572_v19, %v578_v30  ;;  %v587_v38 = vcombine.high %v579_v34, %v579_v34  ;;  %v595_v25 = vrot.slane %v579_v34, %v578_v30 }
 0x48e   :  { %v588_v40 = vcombine.high %v586_v37, %v586_v37  ;;  %v602_v42 = vrot.slane %v586_v37, %v578_v30  ;;  %v609_v43 = vrot.slane %v587_v38, %v578_v30  ;;  %v617_v44 = vcombine.high %v595_v25, %v595_v25 }
 0x48f   :  { %v622_v47 = vrot.slane %v595_v25, %v621_v35 }
 0x490   :  { %v616_v48 = vrot.slane %v588_v40, %v578_v30  ;;  %v618_v51 = vcombine.high %v609_v43, %v609_v43  ;;  %v626_v52 = vrot.slane %v609_v43, %v621_v35  ;;  %v630_v23 = vrot.slane %v617_v44, %v621_v35 }
 0x491   :  { %v649_v56 = vmul.f32 %v622_v47, %v1257_v55  ;;  %v638_v58 = vrot.slane %v602_v42, %v621_v35  ;;  %v767_v55 = vmul.f32 %v1229_v31, %v1198_v50 }
 0x492   :  { %v650_v32 = vmul.f32 %v1255_v54, %v626_v52  ;;  %v651_v59 = vmul.f32 %v630_v23, %v1265_v57  ;;  %v634_v62 = vrot.slane %v618_v51, %v621_v35  ;;  %v642_v61 = vrot.slane %v616_v48, %v621_v35 }
 0x493   :  { %929 = vmatprep.mubr.f32.mxu1 %v649_v56  ;;  %v653_v0 = vmul.f32 %v638_v58, %v1275_v63  ;;  %v766_v54 = vmul.f32 %v1224_v27, %v1196_v49  ;;  %v769_v63 = vmul.f32 %v1235_v17, %v1202_v53  ;;  %v771_v27 = vmul.f32 %v1251_v46, %v1241_v41 }
 0x494   :  { %930 = vmatmul.mubr.f32.vlgmr.msra.gmra.mrb[2].mxu1 %v650_v32  ;;  %v652_v36 = vmul.f32 %v1261_v29, %v634_v62  ;;  %v654_v1 = vmul.f32 %v1271_v60, %v642_v61  ;;  %v768_v29 = vmul.f32 %v1232_v33, %v1200_v20 }
 0x495   :  { %932 = vmatprep.mubr.f32.mxu1 %v651_v59 }
 0x498   :  { %933 = vmatmul.mubr.f32.gmra.mrb[4].mxu1 %v652_v36 }
 0x499   :  { %935 = vmatprep.mubr.f32.mxu1 %v653_v0 }
 0x49c   :  { %936 = vmatmul.mubr.f32.gmra.mrb[6].mxu1 %v654_v1 }
 0x567   :  { %v931_v57 = vpop.f32.mrb[2].mxu1 }
 0x568   :  { %v773_v2 = vmul.f32 %v931_v57, %v767_v55  ;;  %v737_v4 = vpop.f32.mrb[3].mxu1 }
 0x569   :  { %v772_v5 = vmul.f32 %v766_v54, %v737_v4 }
 0x56a   :  { %v779_v60 = vadd.f32 %v773_v2, %v1159_v11  ;;  %v770_v11 = vmul.f32 %v1249_v45, %v1239_v39 }
 0x56b   :  { %v778_v7 = vadd.f32 %v772_v5, %v1157_v10  ;;  %v934_v8 = vpop.f32.mrb[4].mxu1 }
 0x56c   :  { %785 = vst [vmem:[%s1388_s6 + $0x8] sm:$0xff] %v779_v60  ;;  %v775_v49 = vmul.f32 %v934_v8, %v769_v63  ;;  %v747_v50 = vpop.f32.mrb[5].mxu1 }
 0x56d   :  { %784 = vst [vmem:[%s1388_s6] sm:$0xff] %v778_v7  ;;  %v774_v53 = vmul.f32 %v768_v29, %v747_v50 }
 0x56e   :  { %v781_v10 = vadd.f32 %v775_v49, %v1169_v22 }
 0x56f   :  { %v780_v20 = vadd.f32 %v774_v53, %v1167_v21  ;;  %v937_v31 = vpop.f32.mrb[6].mxu1 }
 0x570   :  { %787 = vst [vmem:[%s1388_s6 + $0x18] sm:$0xff] %v781_v10  ;;  %v777_v33 = vmul.f32 %v937_v31, %v771_v27  ;;  %v757_v17 = vpop.f32.mrb[7].mxu1 }
 0x571   :  { %786 = vst [vmem:[%s1388_s6 + $0x10] sm:$0xff] %v780_v20  ;;  %v776_v41 = vmul.f32 %v770_v11, %v757_v17 }
 0x572   :  { %v783_v46 = vadd.f32 %v777_v33, %v1216_v12 }
 0x573   :  { %v782_v39 = vadd.f32 %v776_v41, %v1211_v6 }
 0x574   :  { %789 = vst [vmem:[%s1388_s6 + $0x28] sm:$0xff] %v783_v46 }
 0x575   :  { %788 = vst [vmem:[%s1388_s6 + $0x20] sm:$0xff] %v782_v39 }

</bundles_post_ra>
